<compile_context>
chip_gen: v5e
topology: v5e:2x2
jax: 0.10.0
libtpu: 0.0.40
codegen_flags: <defaults>
</compile_context>

<pallas_src>
import functools

import jax
import jax.numpy as jnp
from jax.experimental import pallas as pl
from jax.experimental.pallas import tpu as pltpu

_LANE = 128
_SUBLANE = 8
_VMEM_TILE_BUDGET = 24 * 1024 * 1024   # conservative budget for tile-size math
_VMEM_LIMIT_BYTES = 40 * 1024 * 1024   # explicit scoped limit (< v7x 64 MiB physical)


def _round_up(x, m):
    return ((x + m - 1) // m) * m


# ----------------------------------------------------------------------------
# One-time parameter packing (init-time layout plumbing, NOT per-forward work).
# ----------------------------------------------------------------------------
def pack_mlp_head_params(w_pi1, b_pi1, w_pi2, b_pi2, w_v1, b_v1, w_v2, b_v2,
                         compute_dtype=jnp.bfloat16):
    """Pack both heads into lane-aligned fused weights.

    Layer-1 weights of both heads are concatenated along the output dim (each
    head's hidden padded to a multiple of 128 lanes); layer-2 weights are laid
    out block-diagonally so a single matmul produces a lane-dense [pi | v]
    slab. Weights are stored in `compute_dtype` (bf16 by default, for the fast
    MXU path); biases stay f32 so bias+relu run in f32 on all generations.
    Returns ((w1, b1, w2, b2), (d_pi, d_v)).
    """
    h_pi, h_v = w_pi1.shape[1], w_v1.shape[1]
    d_pi, d_v = w_pi2.shape[1], w_v2.shape[1]
    F = w_pi1.shape[0]

    h_pi_p = _round_up(h_pi, _LANE)
    h_v_p = _round_up(h_v, _LANE)
    H = h_pi_p + h_v_p                       # 384 for the default sizes
    out_p = _round_up(d_pi + d_v, _LANE)     # 128 for the default sizes

    w1 = jnp.zeros((F, H), compute_dtype)
    w1 = w1.at[:, :h_pi].set(w_pi1.astype(compute_dtype))
    w1 = w1.at[:, h_pi_p:h_pi_p + h_v].set(w_v1.astype(compute_dtype))
    b1 = jnp.zeros((1, H), jnp.float32)
    b1 = b1.at[:, :h_pi].set(b_pi1.reshape(1, -1).astype(jnp.float32))
    b1 = b1.at[:, h_pi_p:h_pi_p + h_v].set(b_v1.reshape(1, -1).astype(jnp.float32))

    w2 = jnp.zeros((H, out_p), compute_dtype)
    w2 = w2.at[:h_pi, :d_pi].set(w_pi2.astype(compute_dtype))
    w2 = w2.at[h_pi_p:h_pi_p + h_v, d_pi:d_pi + d_v].set(w_v2.astype(compute_dtype))
    b2 = jnp.zeros((1, out_p), jnp.float32)
    b2 = b2.at[:, :d_pi].set(b_pi2.reshape(1, -1).astype(jnp.float32))
    b2 = b2.at[:, d_pi:d_pi + d_v].set(b_v2.reshape(1, -1).astype(jnp.float32))

    return (w1, b1, w2, b2), (int(d_pi), int(d_v))


# ----------------------------------------------------------------------------
# Kernel
# ----------------------------------------------------------------------------
def mlp_head_kernel(x_ref, w1_ref, b1_ref, w2_ref, b2_ref, pi_ref, v_ref,
                    *, d_pi, d_v):
    # Cast the streamed x tile to the weight dtype (bf16) in VMEM — keeps x's
    # HBM traffic unchanged while enabling the fast bf16 MXU path.
    x = x_ref[...].astype(w1_ref.dtype)
    # Layer 1: both heads packed along the output dim; f32 accumulate on MXU.
    h = jnp.dot(x, w1_ref[...], preferred_element_type=jnp.float32)
    h = jnp.maximum(h + b1_ref[...], 0.0)          # f32 bias + relu (v5e-safe)
    # Layer 2: block-diagonal packed weights -> single lane-dense matmul.
    o = jnp.dot(h.astype(w2_ref.dtype), w2_ref[...],
                preferred_element_type=jnp.float32)
    o = jnp.maximum(o + b2_ref[...], 0.0)
    # Split the [pi | v] slab in-kernel; two direct stores, no wrapper slices.
    pi_ref[...] = o[:, :d_pi].astype(pi_ref.dtype)
    v_ref[...] = o[:, d_pi:d_pi + d_v].astype(v_ref.dtype)


def _choose_tile_b(batch, f, h, out_p, d_out, x_bytes, w_bytes, max_tile_b=512):
    """Batch tile: multiple of 8, bounded by a VMEM budget, and small enough
    to give >= 4 grid steps when the batch allows (>= 2 steps per TensorCore
    on v7x so DMA of tile i+1 overlaps compute of tile i)."""
    padded = _round_up(max(batch, _SUBLANE), _SUBLANE)
    # Resident weights/biases (single-buffered via pl.Buffered(1)).
    weight_bytes = (f * h + h * out_p) * w_bytes + (h + out_p) * 4
    avail = max(_VMEM_TILE_BUDGET - weight_bytes, 1 << 20)
    # Per-row VMEM: double-buffered x tile + double-buffered outputs +
    # intermediates (h f32, h bf16, o f32).
    per_row = (2 * f * x_bytes + 2 * d_out * 4
               + h * 4 + h * w_bytes + out_p * 4)
    cap = max(_SUBLANE, (avail // per_row) // _SUBLANE * _SUBLANE)
    tile = min(max_tile_b, cap, _round_up(pl.cdiv(padded, 4), _SUBLANE))
    return int(max(_SUBLANE, min(tile, padded)))


@functools.partial(jax.jit, static_argnames=("d_pi", "d_v", "max_tile_b"))
def shared_stack_mlp_head_forward(x, w1, b1, w2, b2, *, d_pi, d_v,
                                  max_tile_b=512):
    """Fused forward of SharedStackMlpHead on pre-packed params.

    Returns (latent_pi, latent_vf) with shapes (B, d_pi) and (B, d_v).
    """
    B, F = x.shape
    H, out_p = w2.shape
    out_dtype = x.dtype
    x_bytes = x.dtype.itemsize
    w_bytes = w1.dtype.itemsize

    tile_b = _choose_tile_b(B, F, H, out_p, d_pi + d_v, x_bytes, w_bytes,
                            max_tile_b)
    grid = (pl.cdiv(B, tile_b),)      # ragged last block handled by Pallas

    flops = 2 * B * (F * H + H * out_p)
    bytes_accessed = (B * F * x_bytes + (F * H + H * out_p) * w_bytes
                      + B * (d_pi + d_v) * out_dtype.itemsize)

    # Grid-invariant operands: constant index_map + single buffering.
    resident = functools.partial(pl.BlockSpec, pipeline_mode=pl.Buffered(1))
    kernel = functools.partial(mlp_head_kernel, d_pi=d_pi, d_v=d_v)

    pi, v = pl.pallas_call(
        kernel,
        out_shape=(jax.ShapeDtypeStruct((B, d_pi), out_dtype),
                   jax.ShapeDtypeStruct((B, d_v), out_dtype)),
        grid_spec=pltpu.PrefetchScalarGridSpec(
            num_scalar_prefetch=0,
            grid=grid,
            in_specs=[
                pl.BlockSpec((tile_b, F), lambda i: (i, 0)),  # x tile (streamed)
                resident((F, H), lambda i: (0, 0)),           # packed W1 (resident)
                resident((1, H), lambda i: (0, 0)),           # packed b1 (f32)
                resident((H, out_p), lambda i: (0, 0)),       # packed W2 (resident)
                resident((1, out_p), lambda i: (0, 0)),       # packed b2 (f32)
            ],
            out_specs=[
                pl.BlockSpec((tile_b, d_pi), lambda i: (i, 0)),
                pl.BlockSpec((tile_b, d_v), lambda i: (i, 0)),
            ],
        ),
        compiler_params=pltpu.CompilerParams(
            dimension_semantics=("parallel",),
            vmem_limit_bytes=_VMEM_LIMIT_BYTES),
        cost_estimate=pl.CostEstimate(
            flops=flops, transcendentals=0, bytes_accessed=bytes_accessed),
    )(x, w1, b1, w2, b2)
    return pi, v


# ----------------------------------------------------------------------------
# Deterministic synthetic params matching nn.Linear shapes (transposed).
# ----------------------------------------------------------------------------
def init_params(key, feature_dim, last_layer_dim_pi=64, last_layer_dim_vf=64,
                dtype=jnp.float32):
    ks = jax.random.split(key, 8)

    def linear(kw, kb, fan_in, fan_out):
        bound = 1.0 / jnp.sqrt(fan_in)
        w = jax.random.uniform(kw, (fan_in, fan_out), dtype, -bound, bound)
        b = jax.random.uniform(kb, (1, fan_out), dtype, -bound, bound)
        return w, b

    w_pi1, b_pi1 = linear(ks[0], ks[1], feature_dim, 256)
    w_pi2, b_pi2 = linear(ks[2], ks[3], 256, last_layer_dim_pi)
    w_v1, b_v1 = linear(ks[4], ks[5], feature_dim, 64)
    w_v2, b_v2 = linear(ks[6], ks[7], 64, last_layer_dim_vf)
    return w_pi1, b_pi1, w_pi2, b_pi2, w_v1, b_v1, w_v2, b_v2


if __name__ == "__main__":
    key = jax.random.PRNGKey(0)
    k_x, k_p = jax.random.split(key)

    batch = 4
    feature_dim = 32
    last_layer_dim_pi = 64
    last_layer_dim_vf = 64

    x = jax.random.normal(k_x, (batch, feature_dim), jnp.float32)
    raw = init_params(k_p, feature_dim, last_layer_dim_pi, last_layer_dim_vf)
    w_pi1, b_pi1, w_pi2, b_pi2, w_v1, b_v1, w_v2, b_v2 = raw

    # One-time packing at parameter-init time (not per forward call).
    packed, (d_pi, d_v) = pack_mlp_head_params(*raw)

    pi, v = shared_stack_mlp_head_forward(x, *packed, d_pi=d_pi, d_v=d_v)
    pi, v = jax.block_until_ready((pi, v))

    relu = lambda t: jnp.maximum(t, 0.0)
    bf16 = jnp.bfloat16
    mm = lambda a, w: jnp.dot(a.astype(bf16), w.astype(bf16),
                              preferred_element_type=jnp.float32)

    # Dtype-matched reference (same bf16 casts, f32 accumulate): tight check
    # of the kernel itself.
    pi_bf = relu(mm(relu(mm(x, w_pi1) + b_pi1), w_pi2) + b_pi2)
    v_bf = relu(mm(relu(mm(x, w_v1) + b_v1), w_v2) + b_v2)
    # Full-f32 reference (PyTorch module semantics): loose check — expected
    # deviation comes only from bf16 operand rounding.
    pi_f32 = relu(relu(x @ w_pi1 + b_pi1) @ w_pi2 + b_pi2)
    v_f32 = relu(relu(x @ w_v1 + b_v1) @ w_v2 + b_v2)

    assert pi.shape == (batch, last_layer_dim_pi)
    assert v.shape == (batch, last_layer_dim_vf)
    assert jnp.allclose(pi, pi_bf, atol=1e-3, rtol=1e-3)
    assert jnp.allclose(v, v_bf, atol=1e-3, rtol=1e-3)
    assert jnp.allclose(pi, pi_f32, atol=3e-2, rtol=3e-2)
    assert jnp.allclose(v, v_f32, atol=3e-2, rtol=3e-2)

    print("KERNEL_OK")
</pallas_src>

<mosaic_0001>
module attributes {stable_mosaic.version = 11 : i64} {
  func.func @mlp_head_kernel(%arg0: i32, %arg1: memref<8x32xf32, #tpu.memory_space<vmem>>, %arg2: memref<32x384xbf16, #tpu.memory_space<vmem>>, %arg3: memref<1x384xf32, #tpu.memory_space<vmem>>, %arg4: memref<384x128xbf16, #tpu.memory_space<vmem>>, %arg5: memref<1x128xf32, #tpu.memory_space<vmem>>, %arg6: memref<8x64xf32, #tpu.memory_space<vmem>>, %arg7: memref<8x64xf32, #tpu.memory_space<vmem>>) attributes {dimension_semantics = [#tpu.dimension_semantics<parallel>], iteration_bounds = array<i64: 1>, scalar_prefetch = 0 : i64, scratch_operands = 0 : i64, tpu.core_type = #tpu.core_type<tc>, window_params = [{transform_indices = @transform_0, window_bounds = array<i64: 8, 32>}, {pipeline_mode = #tpu.pipeline_mode<synchronous>, transform_indices = @transform_1, window_bounds = array<i64: 32, 384>}, {pipeline_mode = #tpu.pipeline_mode<synchronous>, transform_indices = @transform_2, window_bounds = array<i64: 1, 384>}, {pipeline_mode = #tpu.pipeline_mode<synchronous>, transform_indices = @transform_3, window_bounds = array<i64: 384, 128>}, {pipeline_mode = #tpu.pipeline_mode<synchronous>, transform_indices = @transform_4, window_bounds = array<i64: 1, 128>}, {transform_indices = @transform_5, window_bounds = array<i64: 8, 64>}, {transform_indices = @transform_6, window_bounds = array<i64: 8, 64>}]} {
    %c0 = arith.constant 0 : index
    %c0_0 = arith.constant 0 : index
    %0 = vector.load %arg1[%c0, %c0_0] : memref<8x32xf32, #tpu.memory_space<vmem>>, vector<8x32xf32>
    %1 = arith.truncf %0 : vector<8x32xf32> to vector<8x32xbf16>
    %c0_1 = arith.constant 0 : index
    %c0_2 = arith.constant 0 : index
    %2 = vector.load %arg2[%c0_1, %c0_2] : memref<32x384xbf16, #tpu.memory_space<vmem>>, vector<32x384xbf16>
    %cst = arith.constant dense<0.000000e+00> : vector<8x384xf32>
    %3 = tpu.matmul %1, %2, %cst {dimension_numbers = #tpu.dot_dimension_numbers<[1], [0], [0], [1], [0, 0, 1, 1], [], []>} : vector<8x32xbf16>, vector<32x384xbf16>, vector<8x384xf32> -> vector<8x384xf32>
    %c0_3 = arith.constant 0 : index
    %c0_4 = arith.constant 0 : index
    %4 = vector.load %arg3[%c0_3, %c0_4] : memref<1x384xf32, #tpu.memory_space<vmem>>, vector<1x384xf32>
    %5 = vector.broadcast %4 : vector<1x384xf32> to vector<8x384xf32>
    %6 = arith.addf %3, %5 : vector<8x384xf32>
    %cst_5 = arith.constant 0.000000e+00 : f32
    %7 = vector.broadcast %cst_5 : f32 to vector<8x384xf32>
    %8 = arith.maximumf %6, %7 : vector<8x384xf32>
    %9 = arith.truncf %8 : vector<8x384xf32> to vector<8x384xbf16>
    %c0_6 = arith.constant 0 : index
    %c0_7 = arith.constant 0 : index
    %10 = vector.load %arg4[%c0_6, %c0_7] : memref<384x128xbf16, #tpu.memory_space<vmem>>, vector<384x128xbf16>
    %cst_8 = arith.constant dense<0.000000e+00> : vector<8x128xf32>
    %11 = tpu.matmul %9, %10, %cst_8 {dimension_numbers = #tpu.dot_dimension_numbers<[1], [0], [0], [1], [0, 0, 1, 1], [], []>} : vector<8x384xbf16>, vector<384x128xbf16>, vector<8x128xf32> -> vector<8x128xf32>
    %c0_9 = arith.constant 0 : index
    %c0_10 = arith.constant 0 : index
    %12 = vector.load %arg5[%c0_9, %c0_10] : memref<1x128xf32, #tpu.memory_space<vmem>>, vector<1x128xf32>
    %13 = vector.broadcast %12 : vector<1x128xf32> to vector<8x128xf32>
    %14 = arith.addf %11, %13 : vector<8x128xf32>
    %cst_11 = arith.constant 0.000000e+00 : f32
    %15 = vector.broadcast %cst_11 : f32 to vector<8x128xf32>
    %16 = arith.maximumf %14, %15 : vector<8x128xf32>
    %17 = vector.extract_strided_slice %16 {offsets = [0, 0], sizes = [8, 64], strides = [1, 1]} : vector<8x128xf32> to vector<8x64xf32>
    %c0_12 = arith.constant 0 : index
    %c0_13 = arith.constant 0 : index
    %18 = vector.load %arg6[%c0_12, %c0_13] : memref<8x64xf32, #tpu.memory_space<vmem>>, vector<8x64xf32>
    tpu.vector_store %arg6[%c0_12, %c0_13], %17 {strides = array<i32>} : memref<8x64xf32, #tpu.memory_space<vmem>>, vector<8x64xf32>,
    %19 = vector.extract_strided_slice %16 {offsets = [0, 64], sizes = [8, 64], strides = [1, 1]} : vector<8x128xf32> to vector<8x64xf32>
    %c0_14 = arith.constant 0 : index
    %c0_15 = arith.constant 0 : index
    %20 = vector.load %arg7[%c0_14, %c0_15] : memref<8x64xf32, #tpu.memory_space<vmem>>, vector<8x64xf32>
    tpu.vector_store %arg7[%c0_14, %c0_15], %19 {strides = array<i32>} : memref<8x64xf32, #tpu.memory_space<vmem>>, vector<8x64xf32>,
    return
  }
  func.func @transform_0(%arg0: i32) -> (i32, i32) {
    %c0_i32 = arith.constant 0 : i32
    %c0_i32_0 = arith.constant 0 : i32
    return %arg0, %c0_i32 : i32, i32
  }
  func.func @transform_1(%arg0: i32) -> (i32, i32) {
    %c0_i32 = arith.constant 0 : i32
    %c0_i32_0 = arith.constant 0 : i32
    %c0_i32_1 = arith.constant 0 : i32
    return %c0_i32, %c0_i32_0 : i32, i32
  }
  func.func @transform_2(%arg0: i32) -> (i32, i32) {
    %c0_i32 = arith.constant 0 : i32
    %c0_i32_0 = arith.constant 0 : i32
    %c0_i32_1 = arith.constant 0 : i32
    return %c0_i32, %c0_i32_0 : i32, i32
  }
  func.func @transform_3(%arg0: i32) -> (i32, i32) {
    %c0_i32 = arith.constant 0 : i32
    %c0_i32_0 = arith.constant 0 : i32
    %c0_i32_1 = arith.constant 0 : i32
    return %c0_i32, %c0_i32_0 : i32, i32
  }
  func.func @transform_4(%arg0: i32) -> (i32, i32) {
    %c0_i32 = arith.constant 0 : i32
    %c0_i32_0 = arith.constant 0 : i32
    %c0_i32_1 = arith.constant 0 : i32
    return %c0_i32, %c0_i32_0 : i32, i32
  }
  func.func @transform_5(%arg0: i32) -> (i32, i32) {
    %c0_i32 = arith.constant 0 : i32
    %c0_i32_0 = arith.constant 0 : i32
    return %arg0, %c0_i32 : i32, i32
  }
  func.func @transform_6(%arg0: i32) -> (i32, i32) {
    %c0_i32 = arith.constant 0 : i32
    %c0_i32_0 = arith.constant 0 : i32
    return %arg0, %c0_i32 : i32, i32
  }
}

</mosaic_0001>

<bundles_post_ra>
// kernel: shared_stack_mlp_head_forward.1
= control target key start
LH: loop header
LB: loop body
LE: loop exit
PB: predicated region body
PF: predicated region fallthrough
CT: control target
= control target key end

     0   :  { %12 = vsyncpa [#allocation3], 0  ;;  %s867_s0 = inlined_call_operand.hbm [shape: f32[4,32], index: 0, kind: input, shape index: {}]   ;;  %s868_s1 = inlined_call_operand.hbm [shape: bf16[32,384], index: 1, kind: input, shape index: {}]   ;;  %s869_s2 = inlined_call_operand.hbm [shape: f32[1,384], index: 2, kind: input, shape index: {}]   ;;  %s870_s3 = inlined_call_operand.hbm [shape: bf16[384,128], index: 3, kind: input, shape index: {}]   ;;  %s871_s4 = inlined_call_operand.vmem [shape: f32[1,128], index: 4, kind: input, shape index: {}]   ;;  %s872_s5 = inlined_call_operand.hbm [shape: f32[4,64], index: 5, kind: output, shape index: {0}]   ;;  %s873_s6 = inlined_call_operand.hbm [shape: f32[4,64], index: 6, kind: output, shape index: {1}]  }
   0x1   :  { %13 = vsyncpa [#allocation6], 0 }
   0x2   :  { %14 = vsyncpa [#allocation9], 0 }
   0x3   :  { %15 = vsyncpa [#allocation4], 0 }
   0x4   :  { %16 = vsyncpa [#allocation12], 0  ;;  %s34_s23 = sshll.u32 %s868_s1, 4  ;;  %s35_s23 = int_to_ptr.hbm [resolvable:$true] %s34_s23 }
   0x5   :  { %20 = vsyncadd [#allocation3], 64  ;;  %s785_s24 = smov [#allocation5]   ;;  %s21_s28 = sshll.u32 %s867_s0, 4  ;;  %s22_s28 = int_to_ptr.hbm [resolvable:$true] %s21_s28 }
   0x6   :  { %s36_s25 = sshll.u32 %s785_s24, 4  ;;  %s786_s29 = smov 192   ;;  %s37_s25 = int_to_ptr.vmem [resolvable:$true] %s36_s25 }
   0x7   :  { %s787_s30 = smov 12   ;;  %s788_s7 = smov [#allocation2]  }
   0x8   :  { %42 = dma.hbm_to_vmem [thread:$0]  %s35_s23, 768, %s37_s25, [#allocation6], %s786_s29, %s786_s29, %s787_s30  }
   0x9   :  { %s23_s8 = sshll.u32 %s788_s7, 4  ;;  %s789_s9 = smov 64   ;;  %s24_s8 = int_to_ptr.vmem [resolvable:$true] %s23_s8 }
   0xa   :  { %s790_s10 = smov 4   ;;  %s48_s12 = sshll.u32 %s869_s2, 4  ;;  %s49_s12 = int_to_ptr.hbm [resolvable:$true] %s48_s12 }
   0xb   :  { %29 = dma.hbm_to_vmem [thread:$0]  %s22_s28, 64, %s24_s8, [#allocation3], %s789_s9, %s789_s9, %s790_s10  }
   0xc   :  { %s791_s13 = smov [#allocation7]   ;;  %s58_s16 = sshll.u32 %s870_s3, 4  ;;  %s59_s16 = int_to_ptr.hbm [resolvable:$true] %s58_s16 }
   0xd   :  { %s50_s0 = sshll.u32 %s791_s13, 4  ;;  %s792_s17 = smov [#allocation8]   ;;  %s51_s0 = int_to_ptr.vmem [resolvable:$true] %s50_s0 }
   0xe   :  { %53 = dma.hbm_to_vmem [thread:$0]  %s49_s12, 48, %s51_s0, [#allocation6]  }
   0xf   :  { %s60_s18 = sshll.u32 %s792_s17, 4  ;;  %s61_s18 = int_to_ptr.vmem [resolvable:$true] %s60_s18 }
  0x10   :  { %66 = dma.hbm_to_vmem [thread:$0]  %s59_s16, 3072, %s61_s18, [#allocation9], %s789_s9, %s789_s9, %s790_s10  }
  0x11   :  { %775 = dma.done.wait [#allocation3], 128  }
  0x12   :  { %776 = vsyncadd [#allocation3], 4294967168 }
  0x13   :  { %777 = dma.done.wait [#allocation6], 816  }
  0x14   :  { %778 = vsyncadd [#allocation6], 4294966480 }
  0x15   :  { %779 = dma.done.wait [#allocation9], 3072  }
  0x16   :  { %780 = vsyncadd [#allocation9], 4294964224  ;;  %v481_v0 = vld [vmem:[#allocation5 + $0x18] sm:$0xf]  ;;  %v594_v1 = vld [vmem:[#allocation5 + $0x20] sm:$0xf0] }
  0x17   :  { %v469_v2 = vld [vmem:[#allocation5] sm:$0xf]  ;;  %v482_v3 = vor.u32 %v594_v1, %v481_v0  ;;  %v591_v4 = vld [vmem:[#allocation5 + $0x8] sm:$0xf0]  ;;  %v593_v7 = vld [vmem:[#allocation5 + $0x1c] sm:$0xf] }
  0x18   :  { %v489_v5 = vld [vmem:[#allocation5 + $0x20] sm:$0xf]  ;;  %v595_v6 = vld [vmem:[#allocation5 + $0x28] sm:$0xf0]  ;;  %v483_v8 = vld [vmem:[#allocation5 + $0x24] sm:$0xf0]  ;;  %v470_v9 = vor.u32 %v591_v4, %v469_v2 }
  0x19   :  { %146 = vmatpush.bf16.msra.mxu2 %v482_v3  ;;  %v86_v10 = vld [vmem:[#allocation2] sm:$0xff]  ;;  %v486_v11 = vor.u32 %v593_v7, %v483_v8  ;;  %v590_v12 = vld [vmem:[#allocation5 + $0x4] sm:$0xf]  ;;  %v490_v13 = vor.u32 %v595_v6, %v489_v5  ;;  %v471_v14 = vld [vmem:[#allocation5 + $0xc] sm:$0xf0]  ;;  %vm136_vm0 = vcmask 261120  }
  0x1a   :  { %v603_v15 = vld [vmem:[#allocation8 + $0x38] sm:$0xff]  ;;  %v477_v16 = vld [vmem:[#allocation5 + $0x8] sm:$0xf]  ;;  %v592_v17 = vld [vmem:[#allocation5 + $0x10] sm:$0xf0]  ;;  %v474_v18 = vor.u32 %v590_v12, %v471_v14  ;;  %v87_v20 = vpack.c.bf16 %v86_v10, %v86_v10  ;;  %vm421_vm1 = vcmask 523264  }
  0x1b   :  { %159 = vmatpush.bf16.msra.mxu1 %v486_v11  ;;  %v611_v19 = vld [vmem:[#allocation8 + $0x78] sm:$0xff]  ;;  %381 = vmatpush.bf16.msra.mxu3 %v603_v15  ;;  %v602_v21 = vld [vmem:[#allocation8 + $0x30] sm:$0xff]  ;;  %v478_v24 = vor.u32 %v592_v17, %v477_v16  ;;  %v601_v25 = vld [vmem:[#allocation8 + $0x28] sm:$0xff] }
  0x1c   :  { %394 = vmatpush.bf16.msra.mxu0 %v611_v19  ;;  %v610_v22 = vld [vmem:[#allocation8 + $0x70] sm:$0xff]  ;;  %v619_v23 = vld [vmem:[#allocation8 + $0xb8] sm:$0xff]  ;;  %v609_v26 = vld [vmem:[#allocation8 + $0x68] sm:$0xff] }
  0x1d   :  { %147 = vmatpush.bf16.msra.mxu2 %v470_v9  ;;  %v618_v27 = vld [vmem:[#allocation8 + $0xb0] sm:$0xff]  ;;  %v600_v28 = vld [vmem:[#allocation8 + $0x20] sm:$0xff]  ;;  %v599_v30 = vld [vmem:[#allocation8 + $0x18] sm:$0xff] }
  0x1e   :  { %v608_v29 = vld [vmem:[#allocation8 + $0x60] sm:$0xff]  ;;  %v607_v31 = vld [vmem:[#allocation8 + $0x58] sm:$0xff]  ;;  %v598_v32 = vld [vmem:[#allocation8 + $0x10] sm:$0xff] }
  0x1f   :  { %160 = vmatpush.bf16.msra.mxu1 %v474_v18  ;;  %382 = vmatpush.bf16.msra.mxu3 %v602_v21  ;;  %v597_v33 = vld [vmem:[#allocation8 + $0x8] sm:$0xff]  ;;  %v606_v35 = vld [vmem:[#allocation8 + $0x50] sm:$0xff]  ;;  %v596_v36 = vld [vmem:[#allocation8] sm:$0xff] }
  0x20   :  { %491 = vmatmul.msk.bf16.vlgmr.msra.gmra.mxu2 %vm136_vm0, %v87_v20  ;;  %395 = vmatpush.bf16.msra.mxu0 %v610_v22  ;;  %v617_v34 = vld [vmem:[#allocation8 + $0xa8] sm:$0xff]  ;;  %v616_v37 = vld [vmem:[#allocation8 + $0xa0] sm:$0xff]  ;;  %v615_v39 = vld [vmem:[#allocation8 + $0x98] sm:$0xff] }
  0x21   :  { %172 = vmatpush.bf16.msrb.mxu2 %v490_v13  ;;  %v605_v38 = vld [vmem:[#allocation8 + $0x48] sm:$0xff]  ;;  %v604_v40 = vld [vmem:[#allocation8 + $0x40] sm:$0xff]  ;;  %v614_v41 = vld [vmem:[#allocation8 + $0x90] sm:$0xff] }
  0x22   :  { %492 = vmatmul.msk.bf16.vlgmr.msra.gmra.mxu1 %vm136_vm0, %v87_v20  ;;  %v613_v42 = vld [vmem:[#allocation8 + $0x88] sm:$0xff]  ;;  %v612_v43 = vld [vmem:[#allocation8 + $0x80] sm:$0xff]  ;;  %v96_v44 = vld [vmem:[#allocation7] sm:$0x7] }
  0x23   :  { %407 = vmatpush.bf16.msrb.mxu1 %v619_v23  ;;  %383 = vmatpush.bf16.msra.mxu3 %v601_v25  ;;  %v99_v45 = vperm.slane %v96_v44, 1  ;;  %v98_v47 = vperm.slane %v96_v44, 0  ;;  %v100_v57 = vperm.slane %v96_v44, 2  ;;  %v630_v2 = vld [vmem:[%s871_s4] ss:$0 sm:$0xff] }
  0x24   :  { %396 = vmatpush.bf16.msra.mxu0 %v609_v26 }
  0x25   :  { %173 = vmatpush.bf16.msrb.mxu2 %v478_v24 }
  0x27   :  { %408 = vmatpush.bf16.msrb.mxu1 %v618_v27  ;;  %384 = vmatpush.bf16.msra.mxu3 %v600_v28 }
  0x28   :  { %397 = vmatpush.bf16.msra.mxu0 %v608_v29 }
  0x2b   :  { %385 = vmatpush.bf16.msra.mxu3 %v599_v30  ;;  %409 = vmatpush.bf16.msrb.mxu1 %v617_v34 }
  0x2c   :  { %398 = vmatpush.bf16.msra.mxu0 %v607_v31 }
  0x2f   :  { %386 = vmatpush.bf16.msra.mxu3 %v598_v32  ;;  %410 = vmatpush.bf16.msrb.mxu1 %v616_v37 }
  0x30   :  { %493 = vmatmul.msk.bf16.vlgmr.msrb.gmra.mxu2 %vm136_vm0, %v87_v20  ;;  %399 = vmatpush.bf16.msra.mxu0 %v606_v35 }
  0x33   :  { %387 = vmatpush.bf16.msra.mxu3 %v597_v33  ;;  %411 = vmatpush.bf16.msrb.mxu1 %v615_v39 }
  0x34   :  { %400 = vmatpush.bf16.msra.mxu0 %v605_v38 }
  0x37   :  { %388 = vmatpush.bf16.msra.mxu3 %v596_v36  ;;  %412 = vmatpush.bf16.msrb.mxu1 %v614_v41 }
  0x38   :  { %401 = vmatpush.bf16.msra.mxu0 %v604_v40 }
  0x3b   :  { %413 = vmatpush.bf16.msrb.mxu1 %v613_v42 }
  0x3f   :  { %414 = vmatpush.bf16.msrb.mxu1 %v612_v43 }
  0x9f   :  { %v162_v46 = vpop.f32.mrf.mxu1 }
  0xa0   :  { %v163_v48 = vadd.f32 %v162_v46, %v99_v45 }
  0xa2   :  { %v180_v49 = vmax.f32 %v163_v48, 0.0 }
  0xa3   :  { %v149_v50 = vpop.f32.mrf.mxu2 }
  0xa4   :  { %v150_v51 = vadd.f32 %v149_v50, %v98_v47  ;;  %v183_v52 = vpack.c.bf16 %v180_v49, %v180_v49 }
  0xa6   :  { %v179_v53 = vmax.f32 %v150_v51, 0.0  ;;  %402 = vmatmul.bf16.vlgmr.msra.gmra.mxu0 %v183_v52 }
  0xa7   :  { %v164_v54 = vpop.f32.mrf.mxu1 }
  0xa8   :  { %v182_v55 = vpack.c.bf16 %v179_v53, %v179_v53 }
  0xaa   :  { %389 = vmatmul.bf16.vlgmr.msra.gmra.mxu3 %v182_v55 }
  0xab   :  { %v151_v56 = vpop.f32.mrf.mxu2 }
  0xb3   :  { %v175_v58 = vpop.f32.mrf.mxu2 }
  0xb4   :  { %v176_v59 = vadd.f32 %v175_v58, %v100_v57 }
  0xb6   :  { %v181_v60 = vmax.f32 %v176_v59, 0.0 }
  0xb8   :  { %v184_v61 = vpack.c.bf16 %v181_v60, %v181_v60 }
  0xba   :  { %415 = vmatmul.bf16.vlgmr.msrb.gmra.mxu1 %v184_v61 }
  0xbb   :  { %v177_v62 = vpop.f32.mrf.mxu2 }
 0x123   :  { %v403_v63 = vpop.f32.mrf.mxu0 }
 0x12b   :  { %v405_v0 = vpop.f32.mrf.mxu0 }
 0x12d   :  { %v390_v1 = vpop.f32.mrf.mxu3 }
 0x12e   :  { %v391_v3 = vadd.f32 %v630_v2, %v390_v1 }
 0x130   :  { %v404_v5 = vadd.f32 %v403_v63, %v391_v3 }
 0x135   :  { %v392_v4 = vpop.f32.mrf.mxu3 }
 0x137   :  { %v416_v6 = vpop.f32.mrf.mxu1 }
 0x138   :  { %v417_v7 = vadd.f32 %v416_v6, %v404_v5 }
 0x13a   :  { %v420_v8 = vmax.f32 %v417_v7, 0.0 }
 0x13c   :  { %424 = vrot.lane.b32.xlu0 %v420_v8, %s789_s9  ;;  %422 = vst.msk [vmem:[#allocation10] sm:$0xff] %vm421_vm1, %v420_v8 }
 0x13f   :  { %v418_v9 = vpop.f32.mrf.mxu1 }
 0x1ae   :  { %v425_v10 = vpop.permute.xlu0 %424 }
 0x1af   :  { %427 = vst.msk [vmem:[#allocation11] sm:$0xff] %vm421_vm1, %v425_v10 }
 0x1b0   :  { %431 = vsyncadd [#allocation4], 64  ;;  %s434_s21 = sshll.u32 %s872_s5, 4  ;;  %s793_s22 = smov [#allocation10]   ;;  %s435_s21 = int_to_ptr.hbm [resolvable:$true] %s434_s21 }
 0x1b1   :  { %s432_s4 = sshll.u32 %s793_s22, 4  ;;  %s433_s4 = int_to_ptr.vmem [resolvable:$true] %s432_s4 }
 0x1b2   :  { %440 = dma.vmem_to_hbm [thread:$0]  %s433_s4, 64, %s435_s21, [#allocation4], %s789_s9, %s789_s9, %s790_s10  }
 0x1b3   :  { %444 = vsyncadd [#allocation12], 64  ;;  %s447_s25 = sshll.u32 %s873_s6, 4  ;;  %s794_s26 = smov [#allocation11]   ;;  %s448_s25 = int_to_ptr.hbm [resolvable:$true] %s447_s25 }
 0x1b4   :  { %s445_s27 = sshll.u32 %s794_s26, 4  ;;  %s446_s27 = int_to_ptr.vmem [resolvable:$true] %s445_s27 }
 0x1b5   :  { %453 = dma.vmem_to_hbm [thread:$0]  %s446_s27, 64, %s448_s25, [#allocation12], %s789_s9, %s789_s9, %s790_s10  }
 0x1b6   :  { %781 = dma.done.wait [#allocation4], 128  }
 0x1b7   :  { %782 = vsyncadd [#allocation4], 4294967168 }
 0x1b8   :  { %783 = dma.done.wait [#allocation12], 128  }
 0x1b9   :  { %784 = vsyncadd [#allocation12], 4294967168 }
 0x1ba   :  { %462 = vsyncpa [#allocation3], 1 }
 0x1bb   :  { %463 = vsyncpa [#allocation6], 1 }
 0x1bc   :  { %464 = vsyncpa [#allocation9], 1 }
 0x1bd   :  { %465 = vsyncpa [#allocation4], 1 }
 0x1be   :  { %466 = vsyncpa [#allocation12], 1 }

</bundles_post_ra>
